<compile_context>
chip_gen: v5e
topology: v5e:2x2
jax: 0.10.0
libtpu: 0.0.40
codegen_flags: <defaults>
</compile_context>

<pallas_src>
import jax
import jax.numpy as jnp
from jax.experimental import pallas as pl
from jax.experimental.pallas import tpu as pltpu


def _mm_kernel(x_ref, w_ref, o_ref):
    # One lane-dense MXU matmul per batch tile with f32 accumulation.
    o_ref[...] = jnp.dot(
        x_ref[...], w_ref[...], preferred_element_type=jnp.float32
    ).astype(o_ref.dtype)


def pallas_linear(x, w, *, tb=128):
    """y = x @ w on TPU via a batch-tiled, lane-dense Pallas kernel.

    x: [B, D] float32, w: [D, D] float32.  D is zero-padded to a multiple of
    128 (lane width) and B to a multiple of `tb`; padding is sliced off after.
    """
    B, D = x.shape
    assert w.shape == (D, D)

    Dp = 128 * pl.cdiv(D, 128)   # lane-dense feature dim
    Bp = tb * pl.cdiv(B, tb)     # whole batch tiles

    x_p = jnp.zeros((Bp, Dp), x.dtype).at[:B, :D].set(x)
    w_p = jnp.zeros((Dp, Dp), w.dtype).at[:D, :D].set(w)

    y_p = pl.pallas_call(
        _mm_kernel,
        out_shape=jax.ShapeDtypeStruct((Bp, Dp), x.dtype),
        grid=(Bp // tb,),
        in_specs=[
            pl.BlockSpec((tb, Dp), lambda i: (i, 0)),   # batch tile of x
            pl.BlockSpec((Dp, Dp), lambda i: (0, 0)),   # folded weight, resident
        ],
        out_specs=pl.BlockSpec((tb, Dp), lambda i: (i, 0)),
        compiler_params=pltpu.CompilerParams(
            dimension_semantics=("parallel",)),
        cost_estimate=pl.CostEstimate(
            flops=2 * Bp * Dp * Dp,
            transcendentals=0,
            bytes_accessed=4 * (2 * Bp * Dp + Dp * Dp)),
    )(x_p, w_p)

    return y_p[:B, :D]


class MyModelPallas:
    """JAX/Pallas counterpart of the reference MyModel."""

    def __init__(self, key):
        k1, k2 = jax.random.split(key)
        # torch.rand -> uniform [0, 1); deterministic init from PRNGKey.
        self.weight1 = jax.random.uniform(k1, (20, 20), dtype=jnp.float32)
        self.weight2 = jax.random.uniform(k2, (20, 20), dtype=jnp.float32)
        # Weights are static -> pre-fold outside the kernel (halves MXU work
        # and removes the serial two-dot dependency chain inside the kernel).
        self.w_folded = jnp.dot(self.weight1, self.weight2,
                                preferred_element_type=jnp.float32)

    def forward(self, x):
        # Reference forward() is `pass` -> returns None.  Match it exactly.
        return None

    def implied_forward(self, x):
        # Implied computation y = x @ weight1 @ weight2, run on TPU via the
        # Pallas kernel against the pre-folded weight.
        return pallas_linear(x, self.w_folded)


if __name__ == "__main__":
    key = jax.random.PRNGKey(0)
    k_model, k_x = jax.random.split(key)

    model = MyModelPallas(k_model)

    # Batch large enough to exercise batch tiling (grid=(2,)) but still small;
    # feature dim 20 matches the module's 20x20 weights.
    B, D = 256, 20
    x = jax.random.uniform(k_x, (B, D), dtype=jnp.float32)

    # Exact reference semantics: forward returns None.
    assert model.forward(x) is None

    # Run the Pallas kernel once and check against a pure-JAX reference.
    y = model.implied_forward(x)
    y = jax.block_until_ready(y)

    y_ref = x @ model.weight1 @ model.weight2
    assert y.shape == (B, D)
    assert jnp.allclose(y, y_ref, atol=1e-4, rtol=1e-4)

    print("KERNEL_OK")
</pallas_src>

<mosaic_0001>
module attributes {stable_mosaic.version = 11 : i64} {
  func.func @_mm_kernel(%arg0: i32, %arg1: memref<128x128xf32, #tpu.memory_space<vmem>>, %arg2: memref<128x128xf32, #tpu.memory_space<vmem>>, %arg3: memref<128x128xf32, #tpu.memory_space<vmem>>) attributes {dimension_semantics = [#tpu.dimension_semantics<parallel>], iteration_bounds = array<i64: 2>, scalar_prefetch = 0 : i64, scratch_operands = 0 : i64, tpu.core_type = #tpu.core_type<tc>, window_params = [{transform_indices = @transform_0, window_bounds = array<i64: 128, 128>}, {pipeline_mode = #tpu.pipeline_mode<synchronous>, transform_indices = @transform_1, window_bounds = array<i64: 128, 128>}, {transform_indices = @transform_2, window_bounds = array<i64: 128, 128>}]} {
    %c0 = arith.constant 0 : index
    %c0_0 = arith.constant 0 : index
    %0 = vector.load %arg1[%c0, %c0_0] : memref<128x128xf32, #tpu.memory_space<vmem>>, vector<128x128xf32>
    %c0_1 = arith.constant 0 : index
    %c0_2 = arith.constant 0 : index
    %1 = vector.load %arg2[%c0_1, %c0_2] : memref<128x128xf32, #tpu.memory_space<vmem>>, vector<128x128xf32>
    %cst = arith.constant dense<0.000000e+00> : vector<128x128xf32>
    %2 = tpu.matmul %0, %1, %cst {dimension_numbers = #tpu.dot_dimension_numbers<[1], [0], [0], [1], [0, 0, 1, 1], [], []>} : vector<128x128xf32>, vector<128x128xf32>, vector<128x128xf32> -> vector<128x128xf32>
    %c0_3 = arith.constant 0 : index
    %c0_4 = arith.constant 0 : index
    %3 = vector.load %arg3[%c0_3, %c0_4] : memref<128x128xf32, #tpu.memory_space<vmem>>, vector<128x128xf32>
    tpu.vector_store %arg3[%c0_3, %c0_4], %2 {strides = array<i32>} : memref<128x128xf32, #tpu.memory_space<vmem>>, vector<128x128xf32>,
    return
  }
  func.func @transform_0(%arg0: i32) -> (i32, i32) {
    %c0_i32 = arith.constant 0 : i32
    %c0_i32_0 = arith.constant 0 : i32
    return %arg0, %c0_i32 : i32, i32
  }
  func.func @transform_1(%arg0: i32) -> (i32, i32) {
    %c0_i32 = arith.constant 0 : i32
    %c0_i32_0 = arith.constant 0 : i32
    %c0_i32_1 = arith.constant 0 : i32
    return %c0_i32, %c0_i32_0 : i32, i32
  }
  func.func @transform_2(%arg0: i32) -> (i32, i32) {
    %c0_i32 = arith.constant 0 : i32
    %c0_i32_0 = arith.constant 0 : i32
    return %arg0, %c0_i32 : i32, i32
  }
}

</mosaic_0001>

<bundles_post_ra>
// kernel: tpu_custom_call.1
= control target key start
LH: loop header
LB: loop body
LE: loop exit
PB: predicated region body
PF: predicated region fallthrough
CT: control target
= control target key end

     0   :  { %7 = vsyncpa [#allocation3], 0  ;;  %s859_s0 = inlined_call_operand.hbm [shape: f32[256,128], index: 0, kind: input, shape index: {}]   ;;  %s860_s1 = inlined_call_operand.hbm [shape: f32[128,128], index: 1, kind: input, shape index: {}]   ;;  %s861_s2 = inlined_call_operand.hbm [shape: f32[256,128], index: 2, kind: output, shape index: {}]  }
   0x1   :  { %9 = vsyncpa [#allocation3 + $0x1], 0 }
   0x2   :  { %10 = vsyncpa [#allocation6], 0 }
   0x3   :  { %11 = vsyncpa [#allocation4], 0 }
   0x4   :  { %13 = vsyncpa [#allocation4 + $0x1], 0  ;;  %s674_s9 = smov 0   ;;  %s676_s10 = smov 0  }
   0x5   :  { %s678_s11 = smov 0   ;;  %s680_s12 = smov 0  }
   0x6 LB: > { %s695_s13 = sadd.s32 4294967295, %s652_s12   ;;  %s395_s14 = sadd.s32 4294967294, %s652_s12   ;;  %s652_s12 = sphi %s680_s12, %s871_s12   ;;  %s648_s11 = sphi %s678_s11, %s870_s11   ;;  %s644_s10 = sphi %s676_s10, %s869_s10   ;;  %s640_s9 = sphi %s674_s9, %s868_s9  }
   0x7   : > { %p39_p0 = scmp.ne.s32.totalorder %s644_s10, %s640_s9  ;;  %p40_p1 = scmp.eq.s32.totalorder %s695_s13, 0 }
   0x8   : > { %p84_p2 = scmp.eq.s32.totalorder %s695_s13, 1  ;;  %p90_p3 = scmp.eq.s32.totalorder %s395_s14, 1 }
   0x9   : > { %p704_p4 = por %p40_p1, %p39_p0  ;;  %p396_p5 = scmp.ge.s32.totalorder %s652_s12, 1 }
   0xa   : > { %p709_p6 = por %p90_p3, %p39_p0  ;;  %p97_p7 = scmp.lt.s32.totalorder %s652_s12, 3 }
   0xb   : > { %s108_s19 = sshll.u32 %s860_s1, 4  ;;  %s654_s21 = smov [#allocation5]   ;;  %s109_s19 = int_to_ptr.hbm [resolvable:$true] %s108_s19 }
   0xc   : > { %p717_p8 = pnand %p396_p5, %p97_p7  ;;  %s110_s22 = sshll.u32 %s654_s21, 4  ;;  %s111_s22 = int_to_ptr.vmem [resolvable:$true] %s110_s22 }
   0xd   : > { %s727_s23 = sadd.s32 1, %s652_s12   ;;  %s655_s24 = smov 128  }
   0xe   : > { %p469_p9 = pneg %p717_p8  ;;  %s656_s25 = smov 8  }
   0xf   : > { %s23_s26 = ssub.s32 %s652_s12, %s727_s23  ;;  %s26_s27 = sadd.s32 1, %s648_s11 }
  0x10   : > { %p470_p10 = pnand %p469_p9, %p40_p1  ;;  %p24_p12 = scmp.eq.s32.totalorder %s23_s26, 0 }
  0x11   : > { %p33_p13 = scmp.ne.s32.totalorder %s648_s11, %s644_s10  ;;  %p34_p0 = scmp.eq.s32.totalorder %s652_s12, 0 }
  0x12   : > { %472 = dma.hbm_to_vmem [thread:$0]  (!%p470_p10), %s109_s19, 2048, %s111_s22, [#allocation6], %s655_s24, %s655_s24, %s656_s25  }
  0x13   : > { %s739_s28 = scalar_select %p24_p12, %s648_s11, %s26_s27  }
  0x14   : > { %p743_p3 = por %p84_p2, %p33_p13  ;;  %p482_p5 = scmp.lt.s32.totalorder %s652_s12, 2 }
  0x15   : > { %s124_s30 = sand.u32 1, %s648_s11   ;;  %s411_s3 = sshll.u32 %s652_s12, 7 }
  0x16   : > { %p35_p7 = por %p34_p0, %p33_p13  ;;  %s399_s4 = sshll.u32 %s124_s30, 7 }
  0x17   : > { %s133_s7 = scalar_lea.hbm %s859_s0, %s411_s3  ;;  %s128_s14 = scalar_lea.vmem [#allocation2], %s399_s4 }
  0x18   : > { %s134_s8 = sshll.u32 %s133_s7, 4  ;;  %s136_s17 = sshll.u32 %s128_s14, 4  ;;  %s135_s8 = int_to_ptr.hbm [resolvable:$true] %s134_s8  ;;  %s137_s17 = int_to_ptr.vmem [resolvable:$true] %s136_s17 }
  0x19   : > { %p753_p9 = pnand %p482_p5, %p35_p7  ;;  %s125_s19 = scalar_lea.sflag [#allocation3], %s124_s30 }
  0x1a   : > { %s552_s21 = sshra.s32 %s135_s8, 4  ;;  %s559_s3 = scalar_lea.hbm %s859_s0, 256  ;;  %s553_s21 = int_to_ptr.hbm [resolvable:$true] %s552_s21 }
  0x1b   : > { %s554_s22 = scalar_lea.hbm %s553_s21, 128  ;;  %p556_p10 = pneg %p753_p9 }
  0x1c   : > { %p555_p2 = scmp.ne.s32.totalorder %s553_s21, %s554_s22  ;;  %p560_p0 = scmp.lt.s32.totalorder %s553_s21, %s859_s0 }
  0x1d   : > { %p561_p5 = scmp.lt.s32.totalorder %s559_s3, %s554_s22 }
  0x1e   : > { %p557_p12 = pnand %p556_p10, %p555_p2 }
  0x1f   : > { %p562_p7 = por %p561_p5, %p560_p0 }
  0x20   : > { %p558_p13 = pneg %p557_p12 }
  0x22   : > { %p563_p11 = pnand %p562_p7, %p558_p13 }
  0x24   : > { %566 = shalt.err (!%p563_p11)
}
  0x25   : > { %476 = dma.hbm_to_vmem [thread:$0]  (!%p753_p9), %s135_s8, 2048, %s137_s17, %s125_s19, %s655_s24, %s655_s24, %s656_s25  }
  0x26   : > { %148 = sbr.rel (%p717_p8) target bundleno = 239 (0xef), region = 28  ;;  %s773_s30 = sand.u32 (!%p717_p8), 1, %s644_s10  }
  0x27   : > { %s403_s6 = sshll.u32 (!%p717_p8), %s773_s30, 7  ;;  %s151_s7 = scalar_lea.sflag (!%p717_p8), [#allocation3], %s773_s30 }
  0x28   : > { %s779_s14 = scalar_lea.vmem (!%p717_p8), [#allocation2], %s403_s6 }
  0x2b   : > { %627 = dma.done.wait (%p704_p4), %s151_s7, 2048  }
  0x2c   : > { %629 = vsyncadd (%p704_p4), %s151_s7, 4294965248 }
  0x2d   : > { %631 = dma.done.wait (%p40_p1), [#allocation6], 2048  }
  0x2e   : > { %633 = vsyncadd (%p40_p1), [#allocation6], 4294965248  ;;  %v214_v0 = vld [vmem:[#allocation5 + $0x78] sm:$0xff]  ;;  %v213_v1 = vld [vmem:[#allocation5 + $0x70] sm:$0xff]  ;;  %s807_s15 = scalar_lea.vmem [#allocation7], %s403_s6  ;;  %s412_s20 = sshll.u32 %s695_s13, 7 }
  0x2f   : > { %414 = vmatpush.msra.mxu2 %v214_v0  ;;  %415 = vmatpush.msra.mxu3 %v214_v0  ;;  %v212_v2 = vld [vmem:[#allocation5 + $0x68] sm:$0xff]  ;;  %v211_v3 = vld [vmem:[#allocation5 + $0x60] sm:$0xff]  ;;  %v210_v4 = vld [vmem:[#allocation5 + $0x58] sm:$0xff]  ;;  %s308_s8 = scalar_lea.hbm %s861_s2, %s412_s20  ;;  %s309_s17 = sshll.u32 %s807_s15, 4  ;;  %s310_s17 = int_to_ptr.vmem [resolvable:$true] %s309_s17 }
  0x30   : > { %215 = vmatpush.msra.mxu0 %v214_v0  ;;  %413 = vmatpush.msra.mxu1 %v214_v0  ;;  %v209_v5 = vld [vmem:[#allocation5 + $0x50] sm:$0xff]  ;;  %v208_v6 = vld [vmem:[#allocation5 + $0x48] sm:$0xff]  ;;  %v207_v7 = vld [vmem:[#allocation5 + $0x40] sm:$0xff]  ;;  %s311_s18 = sshll.u32 %s308_s8, 4  ;;  %s297_s13 = scalar_lea.sflag [#allocation4], %s773_s30  ;;  %s312_s18 = int_to_ptr.hbm [resolvable:$true] %s311_s18 }
  0x31   : > { %417 = vmatpush.msra.mxu2 %v213_v1  ;;  %418 = vmatpush.msra.mxu3 %v213_v1  ;;  %v206_v8 = vld [vmem:[#allocation5 + $0x38] sm:$0xff]  ;;  %v205_v9 = vld [vmem:[#allocation5 + $0x30] sm:$0xff]  ;;  %v204_v10 = vld [vmem:[#allocation5 + $0x28] sm:$0xff]  ;;  %s596_s19 = sshra.s32 %s312_s18, 4  ;;  %s602_s27 = scalar_lea.hbm %s861_s2, 256  ;;  %s597_s19 = int_to_ptr.hbm [resolvable:$true] %s596_s19 }
  0x32   : > { %216 = vmatpush.msra.mxu0 %v213_v1  ;;  %416 = vmatpush.msra.mxu1 %v213_v1  ;;  %v203_v11 = vld [vmem:[#allocation5 + $0x20] sm:$0xff]  ;;  %v202_v12 = vld [vmem:[#allocation5 + $0x18] sm:$0xff]  ;;  %v201_v13 = vld [vmem:[#allocation5 + $0x10] sm:$0xff]  ;;  %s598_s21 = scalar_lea.hbm %s597_s19, 128  ;;  %p603_p11 = scmp.lt.s32.totalorder %s597_s19, %s861_s2 }
  0x33   : > { %420 = vmatpush.msra.mxu2 %v212_v2  ;;  %421 = vmatpush.msra.mxu3 %v212_v2  ;;  %v200_v14 = vld [vmem:[#allocation5 + $0x8] sm:$0xff]  ;;  %v199_v15 = vld [vmem:[#allocation5] sm:$0xff]  ;;  %v193_v24 = vld [vmem:[%s779_s14 + $0x50] sm:$0xff]  ;;  %p599_p1 = scmp.ne.s32.totalorder %s597_s19, %s598_s21  ;;  %p604_p9 = scmp.lt.s32.totalorder %s602_s27, %s598_s21 }
  0x34   : > { %217 = vmatpush.msra.mxu0 %v212_v2  ;;  %419 = vmatpush.msra.mxu1 %v212_v2  ;;  %v191_v16 = vld [vmem:[%s779_s14 + $0x40] sm:$0xff]  ;;  %v192_v20 = vld [vmem:[%s779_s14 + $0x48] sm:$0xff]  ;;  %v197_v25 = vld [vmem:[%s779_s14 + $0x70] sm:$0xff] }
  0x35   : > { %423 = vmatpush.msra.mxu2 %v211_v3  ;;  %424 = vmatpush.msra.mxu3 %v211_v3  ;;  %v195_v17 = vld [vmem:[%s779_s14 + $0x60] sm:$0xff]  ;;  %v196_v21 = vld [vmem:[%s779_s14 + $0x68] sm:$0xff]  ;;  %v185_v26 = vld [vmem:[%s779_s14 + $0x10] sm:$0xff]  ;;  %p600_p4 = pnand %p599_p1, %p743_p3  ;;  %p605_p2 = por %p604_p9, %p603_p11 }
  0x36   : > { %218 = vmatpush.msra.mxu0 %v211_v3  ;;  %422 = vmatpush.msra.mxu1 %v211_v3  ;;  %v183_v18 = vld [vmem:[%s779_s14] sm:$0xff]  ;;  %v184_v22 = vld [vmem:[%s779_s14 + $0x8] sm:$0xff]  ;;  %v189_v27 = vld [vmem:[%s779_s14 + $0x30] sm:$0xff] }
  0x37   : > { %426 = vmatpush.msra.mxu2 %v210_v4  ;;  %427 = vmatpush.msra.mxu3 %v210_v4  ;;  %v187_v19 = vld [vmem:[%s779_s14 + $0x20] sm:$0xff]  ;;  %v188_v23 = vld [vmem:[%s779_s14 + $0x28] sm:$0xff]  ;;  %v194_v28 = vld [vmem:[%s779_s14 + $0x58] sm:$0xff]  ;;  %p601_p8 = pneg %p600_p4 }
  0x38   : > { %219 = vmatpush.msra.mxu0 %v210_v4  ;;  %425 = vmatpush.msra.mxu1 %v210_v4  ;;  %v198_v29 = vld [vmem:[%s779_s14 + $0x78] sm:$0xff] }
  0x39   : > { %429 = vmatpush.msra.mxu2 %v209_v5  ;;  %430 = vmatpush.msra.mxu3 %v209_v5  ;;  %v186_v30 = vld [vmem:[%s779_s14 + $0x18] sm:$0xff]  ;;  %p606_p10 = pnand %p605_p2, %p601_p8 }
  0x3a   : > { %220 = vmatpush.msra.mxu0 %v209_v5  ;;  %428 = vmatpush.msra.mxu1 %v209_v5  ;;  %v190_v31 = vld [vmem:[%s779_s14 + $0x38] sm:$0xff] }
  0x3b   : > { %432 = vmatpush.msra.mxu2 %v208_v6  ;;  %433 = vmatpush.msra.mxu3 %v208_v6 }
  0x3c   : > { %221 = vmatpush.msra.mxu0 %v208_v6  ;;  %431 = vmatpush.msra.mxu1 %v208_v6 }
  0x3d   : > { %435 = vmatpush.msra.mxu2 %v207_v7  ;;  %436 = vmatpush.msra.mxu3 %v207_v7 }
  0x3e   : > { %222 = vmatpush.msra.mxu0 %v207_v7  ;;  %434 = vmatpush.msra.mxu1 %v207_v7 }
  0x3f   : > { %438 = vmatpush.msra.mxu2 %v206_v8  ;;  %439 = vmatpush.msra.mxu3 %v206_v8 }
  0x40   : > { %223 = vmatpush.msra.mxu0 %v206_v8  ;;  %437 = vmatpush.msra.mxu1 %v206_v8 }
  0x41   : > { %441 = vmatpush.msra.mxu2 %v205_v9  ;;  %442 = vmatpush.msra.mxu3 %v205_v9 }
  0x42   : > { %224 = vmatpush.msra.mxu0 %v205_v9  ;;  %440 = vmatpush.msra.mxu1 %v205_v9 }
  0x43   : > { %444 = vmatpush.msra.mxu2 %v204_v10  ;;  %445 = vmatpush.msra.mxu3 %v204_v10 }
  0x44   : > { %225 = vmatpush.msra.mxu0 %v204_v10  ;;  %443 = vmatpush.msra.mxu1 %v204_v10 }
  0x45   : > { %447 = vmatpush.msra.mxu2 %v203_v11  ;;  %448 = vmatpush.msra.mxu3 %v203_v11 }
  0x46   : > { %226 = vmatpush.msra.mxu0 %v203_v11  ;;  %446 = vmatpush.msra.mxu1 %v203_v11 }
  0x47   : > { %450 = vmatpush.msra.mxu2 %v202_v12  ;;  %451 = vmatpush.msra.mxu3 %v202_v12 }
  0x48   : > { %227 = vmatpush.msra.mxu0 %v202_v12  ;;  %449 = vmatpush.msra.mxu1 %v202_v12 }
  0x49   : > { %453 = vmatpush.msra.mxu2 %v201_v13  ;;  %454 = vmatpush.msra.mxu3 %v201_v13 }
  0x4a   : > { %228 = vmatpush.msra.mxu0 %v201_v13  ;;  %452 = vmatpush.msra.mxu1 %v201_v13 }
  0x4b   : > { %456 = vmatpush.msra.mxu2 %v200_v14  ;;  %457 = vmatpush.msra.mxu3 %v200_v14 }
  0x4c   : > { %229 = vmatpush.msra.mxu0 %v200_v14  ;;  %455 = vmatpush.msra.mxu1 %v200_v14 }
  0x4d   : > { %459 = vmatpush.msra.mxu2 %v199_v15  ;;  %460 = vmatpush.msra.mxu3 %v199_v15 }
  0x4e   : > { %255 = vmatmul.f32.vlgmr.msra.gmra.mxu2 %v191_v16  ;;  %267 = vmatmul.f32.vlgmr.msra.gmra.mxu3 %v195_v17 }
  0x4f   : > { %230 = vmatpush.msra.mxu0 %v199_v15  ;;  %458 = vmatpush.msra.mxu1 %v199_v15 }
  0x50   : > { %231 = vmatmul.f32.vlgmr.msra.gmra.mxu0 %v183_v18  ;;  %243 = vmatmul.f32.vlgmr.msra.gmra.mxu1 %v187_v19 }
  0x56   : > { %258 = vmatmul.f32.gmra.mxu2 %v192_v20  ;;  %270 = vmatmul.f32.gmra.mxu3 %v196_v21 }
  0x58   : > { %234 = vmatmul.f32.gmra.mxu0 %v184_v22  ;;  %246 = vmatmul.f32.gmra.mxu1 %v188_v23 }
  0x5e   : > { %261 = vmatmul.f32.gmra.mxu2 %v193_v24  ;;  %273 = vmatmul.f32.gmra.mxu3 %v197_v25 }
  0x60   : > { %237 = vmatmul.f32.gmra.mxu0 %v185_v26  ;;  %249 = vmatmul.f32.gmra.mxu1 %v189_v27 }
  0x66   : > { %264 = vmatmul.f32.gmra.mxu2 %v194_v28  ;;  %276 = vmatmul.f32.gmra.mxu3 %v198_v29 }
  0x68   : > { %240 = vmatmul.f32.gmra.mxu0 %v186_v30  ;;  %252 = vmatmul.f32.gmra.mxu1 %v190_v31 }
  0xcd   : > { %v232_v32 = vpop.f32.mrf.mxu0  ;;  %v244_v33 = vpop.f32.mrf.mxu1 }
  0xce   : > { %280 = vst [vmem:[%s807_s15] sm:$0xff] %v232_v32 }
  0xcf   : > { %284 = vst [vmem:[%s807_s15 + $0x20] sm:$0xff] %v244_v33 }
  0xd1   : > { %v256_v34 = vpop.f32.mrf.mxu2  ;;  %v268_v35 = vpop.f32.mrf.mxu3 }
  0xd2   : > { %288 = vst [vmem:[%s807_s15 + $0x40] sm:$0xff] %v256_v34 }
  0xd3   : > { %292 = vst [vmem:[%s807_s15 + $0x60] sm:$0xff] %v268_v35 }
  0xd5   : > { %v235_v36 = vpop.f32.mrf.mxu0  ;;  %v247_v37 = vpop.f32.mrf.mxu1 }
  0xd6   : > { %281 = vst [vmem:[%s807_s15 + $0x8] sm:$0xff] %v235_v36 }
  0xd7   : > { %285 = vst [vmem:[%s807_s15 + $0x28] sm:$0xff] %v247_v37 }
  0xd9   : > { %v259_v38 = vpop.f32.mrf.mxu2  ;;  %v271_v39 = vpop.f32.mrf.mxu3 }
  0xda   : > { %289 = vst [vmem:[%s807_s15 + $0x48] sm:$0xff] %v259_v38 }
  0xdb   : > { %293 = vst [vmem:[%s807_s15 + $0x68] sm:$0xff] %v271_v39 }
  0xdd   : > { %v238_v40 = vpop.f32.mrf.mxu0  ;;  %v250_v41 = vpop.f32.mrf.mxu1 }
  0xde   : > { %282 = vst [vmem:[%s807_s15 + $0x10] sm:$0xff] %v238_v40 }
  0xdf   : > { %286 = vst [vmem:[%s807_s15 + $0x30] sm:$0xff] %v250_v41 }
  0xe1   : > { %v262_v42 = vpop.f32.mrf.mxu2  ;;  %v274_v43 = vpop.f32.mrf.mxu3 }
  0xe2   : > { %290 = vst [vmem:[%s807_s15 + $0x50] sm:$0xff] %v262_v42 }
  0xe3   : > { %294 = vst [vmem:[%s807_s15 + $0x70] sm:$0xff] %v274_v43 }
  0xe5   : > { %v241_v44 = vpop.f32.mrf.mxu0  ;;  %v253_v45 = vpop.f32.mrf.mxu1 }
  0xe6   : > { %283 = vst [vmem:[%s807_s15 + $0x18] sm:$0xff] %v241_v44 }
  0xe7   : > { %287 = vst [vmem:[%s807_s15 + $0x38] sm:$0xff] %v253_v45 }
  0xe9   : > { %v265_v46 = vpop.f32.mrf.mxu2  ;;  %v277_v47 = vpop.f32.mrf.mxu3 }
  0xea   : > { %291 = vst [vmem:[%s807_s15 + $0x58] sm:$0xff] %v265_v46 }
  0xeb   : > { %295 = vst [vmem:[%s807_s15 + $0x78] sm:$0xff] %v277_v47 }
  0xec   : > { %609 = shalt.err (!%p606_p10)
}
  0xed   : > { %s657_s5 = smov 128   ;;  %s658_s30 = smov 8  }
  0xee   : > { %467 = dma.vmem_to_hbm [thread:$0]  (%p743_p3), %s310_s17, 2048, %s312_s18, %s297_s13, %s657_s5, %s657_s5, %s658_s30  }
  0xef PF: > { %s326_s6 = sand.u32 1, %s640_s9   ;;  %p867_p12 = scmp.ge.s32.totalorder %s652_s12, 2 }
  0xf0   : > { %s327_s7 = scalar_lea.sflag [#allocation4], %s326_s6 }
  0xf1   : > { %p478_p13 = pnand %p867_p12, %p709_p6 }
  0xf3   : > { %p479_p0 = pneg %p478_p13 }
  0xf5   : > { %635 = dma.done.wait (%p479_p0), %s327_s7, 2048  }
  0xf6   : > { %637 = vsyncadd (%p479_p0), %s327_s7, 4294965248  ;;  %p16_p5 = scmp.ge.s32.totalorder %s727_s23, 4   ;;  %s868_s9 = smov %s644_s10 }
  0xf7   : > { %s869_s10 = smov %s648_s11  ;;  %s870_s11 = smov %s739_s28 }
  0xf8   : > { %s871_s12 = smov %s727_s23  ;;  %18 = sbr.rel (!%p16_p5) target bundleno = 6 (0x6), region = 77 }
  0xfd   :  { %333 = vsyncpa [#allocation3], 1 }
  0xfe   :  { %335 = vsyncpa [#allocation3 + $0x1], 1 }
  0xff   :  { %336 = vsyncpa [#allocation6], 1 }
 0x100   :  { %337 = vsyncpa [#allocation4], 1 }
 0x101   :  { %339 = vsyncpa [#allocation4 + $0x1], 1 }

</bundles_post_ra>
